<compile_context>
chip_gen: v6e
topology: v6e:2x2x1
jax: 0.10.0
libtpu: 0.0.40
codegen_flags: <defaults>
</compile_context>

<pallas_src>
import math

import jax
import jax.numpy as jnp
from jax.experimental import pallas as pl
from jax.experimental.pallas import tpu as pltpu


def make_positional_encoding(d_model: int, max_len: int = 5000,
                             dtype=jnp.float32) -> jnp.ndarray:
    """Deterministic pe buffer, identical math to the PyTorch __init__.

    Build this once at model init in the model dtype (mirrors register_buffer).
    Like the PyTorch original it assumes an even d_model.
    """
    position = jnp.arange(0, max_len, dtype=jnp.float32)[:, None]           # [max_len, 1]
    div_term = jnp.exp(
        jnp.arange(0, d_model, 2, dtype=jnp.float32) * (-math.log(10000.0) / d_model))
    pe = jnp.zeros((max_len, d_model), dtype=jnp.float32)
    pe = pe.at[:, 0::2].set(jnp.sin(position * div_term))
    pe = pe.at[:, 1::2].set(jnp.cos(position * div_term))
    return pe.astype(dtype)                                                 # [max_len, d_model]


def _pos_enc_kernel(x_ref, pe_ref, o_ref):
    # x_ref / o_ref: (TB, TS, TC); pe_ref: (TS, TC), broadcast over the batch block.
    # Pure VPU add; the pe tile stays resident across the (innermost) batch axis.
    o_ref[...] = x_ref[...] + pe_ref[...]


def _vmem_budget_bytes() -> int:
    """Scoped-VMEM budget: ~half of physical VMEM, capped at 64 MiB."""
    cap = 64 * 1024 * 1024
    try:
        info = pltpu.get_tpu_info()
        cap = int(getattr(info, "vmem_capacity_bytes", cap))
    except Exception:
        pass
    return max(32 * 1024 * 1024, min(cap // 2, 64 * 1024 * 1024))


def _choose_row_tile(rows: int, row_bytes: int, target_bytes: int, granule: int) -> int:
    """Row tile: sublane-aligned, close to target_bytes, preferring divisors of rows."""
    if rows <= granule:
        return rows                              # tiny input: full extent
    if rows % granule == 0 and rows * row_bytes <= target_bytes:
        return rows                              # whole extent in one aligned block
    max_t = min(rows, max(1, target_bytes // max(1, row_bytes)))
    max_t = max(granule, (max_t // granule) * granule)
    max_t = min(max_t, (rows // granule) * granule)
    for t in range(max_t, granule - 1, -granule):   # prefer an exact divisor of rows
        if rows % t == 0:
            return t
    return max_t                                 # ragged last block (Pallas masks it)


def positional_encoding_forward(x: jnp.ndarray, pe: jnp.ndarray) -> jnp.ndarray:
    """x: [B, S, D]; pe: [max_len, D]. Returns x + pe[:S] broadcast over batch."""
    B, S, D = x.shape
    max_len = pe.shape[0]

    # pe should already be in the model dtype (built once at init). This guard costs
    # an extra HBM pass only if it triggers. Output dtype is x.dtype (see header note).
    if pe.dtype != x.dtype:
        pe = pe.astype(x.dtype)

    itemsize = jnp.dtype(x.dtype).itemsize
    granule = max(8, 32 // itemsize)             # sublane granule (f32: 8, bf16: 16)

    # Lane-dense folding: fold g sequence rows into the last dim so it becomes a
    # multiple of 128 lanes -> unmasked full-lane stores.
    g = 1 if D % 128 == 0 else 128 // math.gcd(D, 128)
    s_eff, x_in, pad = S, x, 0
    if g > 1 and S % g != 0:
        s_pad = ((S + g - 1) // g) * g
        if s_pad <= max_len:
            pad = s_pad - S
            s_eff = s_pad
            # TODO(synk): this pad is one extra pass over x; only taken when S is not
            # a multiple of the fold factor g (kept per review to avoid masked stores).
            x_in = jnp.pad(x, ((0, 0), (0, pad), (0, 0)))
        else:
            g = 1                                # cannot fold: masked-store fallback
    rows, cols = s_eff // g, g * D
    x2 = x_in.reshape(B, rows, cols)

    # Block sizing: ~budget/8 per block (≈4 MiB v7x, ≈8 MiB v5e/v6e). Double-buffered
    # footprint is ~6 blocks, comfortably inside the raised VMEM limit below.
    budget = _vmem_budget_bytes()
    target = max(1 << 20, budget // 8)
    row_bytes = cols * itemsize
    ts = _choose_row_tile(rows, row_bytes, target, granule)

    # Fold several batch elements per block when one sequence is small, so per-step
    # DMAs stay multi-MiB; pe broadcasts across the batch block in-register.
    tb = 1
    if ts == rows and B > 1 and 2 * rows * row_bytes <= target:
        tb_max = min(B, max(1, target // max(1, rows * row_bytes)))
        for t in range(tb_max, 0, -1):
            if B % t == 0:
                tb = t
                break

    # Pass the full pe buffer (free reshape; grid/index_map bounds the access) whenever
    # the row tile is sublane-aligned; otherwise take a tiny prefix view.
    if max_len % g == 0 and (ts % granule == 0 or ts == max_len // g):
        pe2 = pe.reshape(max_len // g, cols)
    else:
        pe2 = pe[:rows * g].reshape(rows, cols)

    n_row = pl.cdiv(rows, ts)
    n_b = B // tb
    # Give the v7x megacore a second block to shard when the grid would be a single step.
    tc = cols // 2 if (n_row * n_b == 1 and cols % 256 == 0) else cols
    n_col = cols // tc

    out2 = pl.pallas_call(
        _pos_enc_kernel,
        out_shape=jax.ShapeDtypeStruct((B, rows, cols), x.dtype),
        grid_spec=pltpu.PrefetchScalarGridSpec(
            num_scalar_prefetch=0,
            # Batch innermost: pe's block index is independent of it, so its tile stays
            # resident across batch steps (pe HBM traffic ~ S*D, not B*S*D).
            grid=(n_row, n_col, n_b),
            in_specs=[
                pl.BlockSpec((tb, ts, tc), lambda s, c, b: (b, s, c)),
                pl.BlockSpec((ts, tc), lambda s, c, b: (s, c)),
            ],
            out_specs=pl.BlockSpec((tb, ts, tc), lambda s, c, b: (b, s, c)),
        ),
        compiler_params=pltpu.CompilerParams(
            dimension_semantics=("parallel", "parallel", "parallel"),
            vmem_limit_bytes=budget,
        ),
        input_output_aliases={0: 0},   # donate x: no second B*S*D output buffer
    )(x2, pe2)

    out = out2.reshape(B, s_eff, D)
    if pad:
        out = out[:, :S, :]
    return out


if __name__ == "__main__":
    fwd = jax.jit(positional_encoding_forward)

    # Case 1: small D (32) -> 4 rows folded into a 128-lane last dim; batch-tiled block.
    x1 = jax.random.normal(jax.random.PRNGKey(0), (2, 8, 32), dtype=jnp.float32)
    pe1 = make_positional_encoding(32, max_len=64, dtype=x1.dtype)
    ref1 = x1 + pe1[None, :8, :]
    out1 = jax.block_until_ready(fwd(x1, pe1))
    assert out1.shape == (2, 8, 32)
    assert jnp.allclose(out1, ref1, atol=1e-6, rtol=1e-6)

    # Case 2: D already a multiple of 128 (no folding).
    x2 = jax.random.normal(jax.random.PRNGKey(0), (2, 16, 128), dtype=jnp.float32)
    pe2 = make_positional_encoding(128, max_len=64, dtype=x2.dtype)
    ref2 = x2 + pe2[None, :16, :]
    out2 = jax.block_until_ready(fwd(x2, pe2))
    assert jnp.allclose(out2, ref2, atol=1e-6, rtol=1e-6)

    # Case 3: S not a multiple of the fold factor -> padded lane-dense path.
    x3 = jax.random.normal(jax.random.PRNGKey(0), (2, 7, 32), dtype=jnp.float32)
    pe3 = make_positional_encoding(32, max_len=64, dtype=x3.dtype)
    ref3 = x3 + pe3[None, :7, :]
    out3 = jax.block_until_ready(fwd(x3, pe3))
    assert out3.shape == (2, 7, 32)
    assert jnp.allclose(out3, ref3, atol=1e-6, rtol=1e-6)

    # Case 4: B=1, one row tile -> lane axis split in two (megacore has 2 blocks).
    x4 = jax.random.normal(jax.random.PRNGKey(0), (1, 256, 512), dtype=jnp.float32)
    pe4 = make_positional_encoding(512, max_len=512, dtype=x4.dtype)
    ref4 = x4 + pe4[None, :256, :]
    out4 = jax.block_until_ready(fwd(x4, pe4))
    assert jnp.allclose(out4, ref4, atol=1e-6, rtol=1e-6)

    # Case 5: bf16 path (16-sublane granule, pe built in bf16 at init -> no cast pass).
    x5 = jax.random.normal(jax.random.PRNGKey(0), (2, 32, 64)).astype(jnp.bfloat16)
    pe5 = make_positional_encoding(64, max_len=64, dtype=jnp.bfloat16)
    ref5 = x5 + pe5[None, :32, :]
    out5 = jax.block_until_ready(fwd(x5, pe5))
    assert jnp.allclose(out5.astype(jnp.float32), ref5.astype(jnp.float32),
                        atol=1e-2, rtol=1e-2)

    print("KERNEL_OK")
</pallas_src>

<mosaic_0001>
module attributes {stable_mosaic.version = 11 : i64} {
  func.func @_pos_enc_kernel(%arg0: i32, %arg1: i32, %arg2: i32, %arg3: memref<2x2x128xf32, #tpu.memory_space<vmem>>, %arg4: memref<2x128xf32, #tpu.memory_space<vmem>>, %arg5: memref<2x2x128xf32, #tpu.memory_space<vmem>>) attributes {dimension_semantics = [#tpu.dimension_semantics<parallel>, #tpu.dimension_semantics<parallel>, #tpu.dimension_semantics<parallel>], iteration_bounds = array<i64: 1, 1, 1>, scalar_prefetch = 0 : i64, scratch_operands = 0 : i64, tpu.core_type = #tpu.core_type<tc>, window_params = [{transform_indices = @transform_0, window_bounds = array<i64: 2, 2, 128>}, {transform_indices = @transform_1, window_bounds = array<i64: 2, 128>}, {transform_indices = @transform_2, window_bounds = array<i64: 2, 2, 128>}]} {
    %c0 = arith.constant 0 : index
    %c0_0 = arith.constant 0 : index
    %c0_1 = arith.constant 0 : index
    %0 = vector.load %arg3[%c0, %c0_0, %c0_1] : memref<2x2x128xf32, #tpu.memory_space<vmem>>, vector<2x2x128xf32>
    %c0_2 = arith.constant 0 : index
    %c0_3 = arith.constant 0 : index
    %1 = vector.load %arg4[%c0_2, %c0_3] : memref<2x128xf32, #tpu.memory_space<vmem>>, vector<2x128xf32>
    %2 = vector.shape_cast %1 : vector<2x128xf32> to vector<1x2x128xf32>
    %3 = vector.broadcast %2 : vector<1x2x128xf32> to vector<2x2x128xf32>
    %4 = arith.addf %0, %3 : vector<2x2x128xf32>
    %c0_4 = arith.constant 0 : index
    %c0_5 = arith.constant 0 : index
    %c0_6 = arith.constant 0 : index
    %5 = vector.load %arg5[%c0_4, %c0_5, %c0_6] : memref<2x2x128xf32, #tpu.memory_space<vmem>>, vector<2x2x128xf32>
    tpu.vector_store %arg5[%c0_4, %c0_5, %c0_6], %4 {strides = array<i32>} : memref<2x2x128xf32, #tpu.memory_space<vmem>>, vector<2x2x128xf32>,
    return
  }
  func.func @transform_0(%arg0: i32, %arg1: i32, %arg2: i32) -> (i32, i32, i32) {
    %c0_i32 = arith.constant 0 : i32
    return %arg2, %arg0, %arg1 : i32, i32, i32
  }
  func.func @transform_1(%arg0: i32, %arg1: i32, %arg2: i32) -> (i32, i32) {
    %c0_i32 = arith.constant 0 : i32
    return %arg0, %arg1 : i32, i32
  }
  func.func @transform_2(%arg0: i32, %arg1: i32, %arg2: i32) -> (i32, i32, i32) {
    %c0_i32 = arith.constant 0 : i32
    return %arg2, %arg0, %arg1 : i32, i32, i32
  }
}

</mosaic_0001>

<bundles_post_ra>
// kernel: positional_encoding_forward.1
= control target key start
LH: loop header
LB: loop body
LE: loop exit
PB: predicated region body
PF: predicated region fallthrough
CT: control target
= control target key end

     0   :  { %s52_s0 = inlined_call_operand.vmem [shape: f32[2,2,128], index: 0, kind: input, shape index: {}, may-alias: {0,2}]   ;;  %s53_s1 = inlined_call_operand.vmem [shape: f32[2,128], index: 1, kind: input, shape index: {}]   ;;  %s54_s2 = inlined_call_operand.vmem [shape: f32[2,2,128], index: 2, kind: output, shape index: {}, may-alias: {0,2}]  }
   0x1   :  { %v11_v0 = vld [vmem:[%s52_s0] sm:$0x3]  ;;  %v12_v2 = vld [vmem:[%s52_s0 + $0x2] sm:$0x3] }
   0x2   :  { %v13_v1 = vld [vmem:[%s53_s1] sm:$0x3] }
   0x3   :  { %v14_v3 = vadd.f32 %v13_v1, %v11_v0  ;;  %v15_v4 = vadd.f32 %v13_v1, %v12_v2 }
   0x5   :  { %16 = vst [vmem:[%s54_s2] sm:$0x3] %v14_v3  ;;  %17 = vst [vmem:[%s54_s2 + $0x2] sm:$0x3] %v15_v4 }

</bundles_post_ra>
